<compile_context>
chip_gen: v7x
topology: tpu7x:2x2x1
jax: 0.10.0
libtpu: 0.0.40
codegen_flags: <defaults>
</compile_context>

<pallas_src>
import functools

import jax
import jax.numpy as jnp
from jax.experimental import pallas as pl
from jax.experimental.pallas import tpu as pltpu


def _round_up(x, m):
    return (x + m - 1) // m * m


def spatial_attention_kernel(wb_ref, x_ref, o_ref, acc_ref, *, pad_h):
    """Channel sum/max accumulation + banded-matmul H-conv + sigmoid.

    wb_ref : (H, 2*Hp) f32 banded conv weights, resident across grid steps.
    x_ref  : (c_blk, H, W) one channel-block of one batch element (native NCHW,
             batch dim squeezed) — no wrapper relayout of x.
    o_ref  : (H, W) attention map for this batch element.
    acc_ref: (2*Hp, W) f32 scratch; rows [0:H] = running channel sum,
             rows [Hp:Hp+H] = running channel max (Hp = H rounded up to 8).
    """
    c_idx = pl.program_id(1)
    c_blk = x_ref.shape[0]
    h, w = o_ref.shape
    hp = pad_h

    @pl.when(c_idx == 0)
    def _init():
        acc_ref[...] = jnp.zeros_like(acc_ref)
        acc_ref[hp:hp + h, :] = jnp.full((h, w), jnp.finfo(jnp.float32).min,
                                         jnp.float32)

    # Carry the accumulators in vregs across the channel block; one VMEM
    # load/store pair per grid step instead of one per channel.
    s0 = acc_ref[0:h, :]
    m0 = acc_ref[hp:hp + h, :]

    def chan_body(c, carry):
        s, m = carry
        xc = x_ref[c].astype(jnp.float32)   # cast once; reused for sum and max
        return s + xc, jnp.maximum(m, xc)

    s, m = jax.lax.fori_loop(0, c_blk, chan_body, (s0, m0),
                             unroll=min(c_blk, 8))
    acc_ref[0:h, :] = s
    acc_ref[hp:hp + h, :] = m

    @pl.when(c_idx == pl.num_programs(1) - 1)
    def _finalize():
        # All 7 taps of the zero-padded H-conv, for both the avg and max
        # feature rows, as a single small matmul on the otherwise-idle MXU:
        # (H, 2*Hp) @ (2*Hp, W) -> (H, W).  1/C is folded into the avg taps.
        conv = jnp.dot(wb_ref[...], acc_ref[...],
                       preferred_element_type=jnp.float32,
                       precision=jax.lax.Precision.HIGHEST)
        o_ref[...] = jax.nn.sigmoid(conv).astype(o_ref.dtype)


def _banded_conv_weight(weight, n_chan, n_h, pad_h):
    """(1, 2, K, 1) conv weight -> (H, 2*Hp) banded matrix W_band so that
    sigmoid-input == W_band @ [channel_sum ; channel_max] (mean's 1/C folded
    into the avg taps; columns outside the valid band / in padding rows = 0)."""
    ksize = weight.shape[2]
    pad = ksize // 2
    w2 = weight.reshape(2, ksize).astype(jnp.float32)
    wa = w2[0] / n_chan                      # avg taps, pre-scaled by 1/C
    wm = w2[1]                               # max taps
    h = jnp.arange(n_h)[:, None]             # output row
    col = jnp.arange(pad_h)[None, :]         # input row within each section
    k = col - h + pad                        # tap index feeding (h, col)
    valid = (k >= 0) & (k < ksize) & (col < n_h)
    k_cl = jnp.clip(k, 0, ksize - 1)
    band_a = jnp.where(valid, wa[k_cl], 0.0)
    band_m = jnp.where(valid, wm[k_cl], 0.0)
    return jnp.concatenate([band_a, band_m], axis=1)   # (H, 2*Hp)


def _pick_channel_block(n_chan, h, w, itemsize, budget=4 << 20):
    """Largest divisor of C (<= 32) whose double-buffered input tile fits a
    small per-step budget; keeps the channel grid short for typical C."""
    best = 1
    for d in range(1, min(n_chan, 32) + 1):
        if n_chan % d == 0 and 2 * d * h * w * itemsize <= budget:
            best = d
    return best


def spatial_attention(x, weight):
    """x: (N, C, H, W); weight: (1, 2, K, 1) from nn.Conv2d(2, 1, (K, 1)).

    Returns sigmoid(conv([mean_c(x), max_c(x)])), shape (N, 1, H, W).
    x is read once in its native NCHW layout (no transpose/pad copies)."""
    n, c, h, w = x.shape
    hp = _round_up(h, 8)                     # sublane-aligned scratch sections
    wb = _banded_conv_weight(weight, c, h, hp)

    itemsize = jnp.dtype(x.dtype).itemsize
    c_blk = _pick_channel_block(c, h, w, itemsize)
    n_c_blocks = c // c_blk

    # VMEM accounting: double-buffered in/out tiles + resident weight + scratch
    # + ~6 live f32 (Hp, W) temporaries inside the kernel body.
    est = (2 * c_blk * h * w * itemsize       # x tile (double buffered)
           + 2 * h * w * itemsize             # out tile (double buffered)
           + 2 * h * 2 * hp * 4               # banded weight
           + 2 * hp * w * 4                   # scratch accumulator
           + 6 * hp * w * 4)                  # live f32 temporaries
    try:
        vmem_cap = pltpu.get_tpu_info().vmem_capacity_bytes
    except Exception:                         # info unavailable -> assume v7x floor
        vmem_cap = 64 << 20
    vmem_limit = int(min(max(2 * est + (2 << 20), 16 << 20), vmem_cap // 2))

    kernel = functools.partial(spatial_attention_kernel, pad_h=hp)

    return pl.pallas_call(
        kernel,
        out_shape=jax.ShapeDtypeStruct((n, 1, h, w), x.dtype),
        grid=(n, n_c_blocks),
        in_specs=[
            # Tiny banded weight: constant block index -> stays resident.
            pl.BlockSpec((h, 2 * hp), lambda i, j: (0, 0)),
            # One contiguous channel-block of one batch element, native layout.
            pl.BlockSpec((None, c_blk, h, w), lambda i, j: (i, j, 0, 0)),
        ],
        out_specs=pl.BlockSpec((None, None, h, w), lambda i, j: (i, 0, 0, 0)),
        scratch_shapes=[pltpu.VMEM((2 * hp, w), jnp.float32)],
        compiler_params=pltpu.CompilerParams(
            dimension_semantics=("parallel", "arbitrary"),
            vmem_limit_bytes=vmem_limit),
    )(wb, x)


def spatial_attention_reference(x, weight):
    avg = jnp.mean(x, axis=1, keepdims=True)
    mx = jnp.max(x, axis=1, keepdims=True)
    feat = jnp.concatenate([avg, mx], axis=1)            # (N, 2, H, W)
    pad = weight.shape[2] // 2
    conv = jax.lax.conv_general_dilated(
        feat, weight, window_strides=(1, 1),
        padding=((pad, pad), (0, 0)),
        dimension_numbers=("NCHW", "OIHW", "NCHW"),
        precision=jax.lax.Precision.HIGHEST)
    return jax.nn.sigmoid(conv)


if __name__ == "__main__":
    key = jax.random.PRNGKey(0)
    kx, kw = jax.random.split(key)

    # small shapes consistent with the module: batch=2, channels=4, spatial 16x16
    x = jax.random.normal(kx, (2, 4, 16, 16), dtype=jnp.float32)
    # conv weight shape (out=1, in=2, kH=7, kW=1), no bias
    weight = 0.1 * jax.random.normal(kw, (1, 2, 7, 1), dtype=jnp.float32)

    out = jax.block_until_ready(spatial_attention(x, weight))
    ref = spatial_attention_reference(x, weight)

    assert out.shape == (2, 1, 16, 16)
    assert jnp.allclose(out, ref, atol=1e-5, rtol=1e-5), "mismatch vs reference"

    print("KERNEL_OK")
</pallas_src>

<mosaic_0001>
module attributes {stable_mosaic.version = 11 : i64} {
  func.func @spatial_attention_kernel(%arg0: i32, %arg1: i32, %arg2: memref<16x32xf32, #tpu.memory_space<vmem>>, %arg3: memref<1x4x16x16xf32, #tpu.memory_space<vmem>>, %arg4: memref<1x1x16x16xf32, #tpu.memory_space<vmem>>, %arg5: memref<32x16xf32, #tpu.memory_space<vmem>>) attributes {dimension_semantics = [#tpu.dimension_semantics<parallel>, #tpu.dimension_semantics<arbitrary>], iteration_bounds = array<i64: 2, 1>, scalar_prefetch = 0 : i64, scratch_operands = 1 : i64, tpu.core_type = #tpu.core_type<tc>, window_params = [{pipeline_mode = #tpu.pipeline_mode<synchronous>, transform_indices = @transform_0, window_bounds = array<i64: 16, 32>}, {transform_indices = @transform_1, window_bounds = array<i64: 1, 4, 16, 16>}, {transform_indices = @transform_2, window_bounds = array<i64: 1, 1, 16, 16>}]} {
    %c0_i32 = arith.constant 0 : i32
    %0 = arith.cmpi eq, %arg1, %c0_i32 : i32
    %1 = arith.extui %0 : i1 to i32
    %c0_i32_0 = arith.constant 0 : i32
    %2 = arith.cmpi ne, %1, %c0_i32_0 : i32
    scf.if %2 {
      %cst = arith.constant 0.000000e+00 : f32
      %30 = vector.broadcast %cst : f32 to vector<32x16xf32>
      %c0_22 = arith.constant 0 : index
      %c0_23 = arith.constant 0 : index
      %31 = vector.load %arg5[%c0_22, %c0_23] : memref<32x16xf32, #tpu.memory_space<vmem>>, vector<32x16xf32>
      tpu.vector_store %arg5[%c0_22, %c0_23], %30 {strides = array<i32>} : memref<32x16xf32, #tpu.memory_space<vmem>>, vector<32x16xf32>,
      %cst_24 = arith.constant -3.40282347E+38 : f32
      %32 = vector.broadcast %cst_24 : f32 to vector<16x16xf32>
      %c16_25 = arith.constant 16 : index
      %c0_26 = arith.constant 0 : index
      %33 = vector.load %arg5[%c16_25, %c0_26] : memref<32x16xf32, #tpu.memory_space<vmem>>, vector<16x16xf32>
      tpu.vector_store %arg5[%c16_25, %c0_26], %32 {strides = array<i32>} : memref<32x16xf32, #tpu.memory_space<vmem>>, vector<16x16xf32>,
    } else {
    }
    %c0 = arith.constant 0 : index
    %c0_1 = arith.constant 0 : index
    %3 = vector.load %arg5[%c0, %c0_1] : memref<32x16xf32, #tpu.memory_space<vmem>>, vector<16x16xf32>
    %c16 = arith.constant 16 : index
    %c0_2 = arith.constant 0 : index
    %4 = vector.load %arg5[%c16, %c0_2] : memref<32x16xf32, #tpu.memory_space<vmem>>, vector<16x16xf32>
    %c0_i32_3 = arith.constant 0 : i32
    %c0_4 = arith.constant 0 : index
    %5 = arith.index_cast %c0_i32_3 : i32 to index
    %c0_5 = arith.constant 0 : index
    %c0_6 = arith.constant 0 : index
    %6 = vector.load %arg3[%c0_4, %5, %c0_5, %c0_6] : memref<1x4x16x16xf32, #tpu.memory_space<vmem>>, vector<1x1x16x16xf32>
    %7 = vector.shape_cast %6 : vector<1x1x16x16xf32> to vector<16x16xf32>
    %8 = arith.addf %3, %7 : vector<16x16xf32>
    %9 = arith.maximumf %4, %7 : vector<16x16xf32>
    %c1_i32 = arith.constant 1 : i32
    %c0_7 = arith.constant 0 : index
    %10 = arith.index_cast %c1_i32 : i32 to index
    %c0_8 = arith.constant 0 : index
    %c0_9 = arith.constant 0 : index
    %11 = vector.load %arg3[%c0_7, %10, %c0_8, %c0_9] : memref<1x4x16x16xf32, #tpu.memory_space<vmem>>, vector<1x1x16x16xf32>
    %12 = vector.shape_cast %11 : vector<1x1x16x16xf32> to vector<16x16xf32>
    %13 = arith.addf %8, %12 : vector<16x16xf32>
    %14 = arith.maximumf %9, %12 : vector<16x16xf32>
    %c2_i32 = arith.constant 2 : i32
    %c0_10 = arith.constant 0 : index
    %15 = arith.index_cast %c2_i32 : i32 to index
    %c0_11 = arith.constant 0 : index
    %c0_12 = arith.constant 0 : index
    %16 = vector.load %arg3[%c0_10, %15, %c0_11, %c0_12] : memref<1x4x16x16xf32, #tpu.memory_space<vmem>>, vector<1x1x16x16xf32>
    %17 = vector.shape_cast %16 : vector<1x1x16x16xf32> to vector<16x16xf32>
    %18 = arith.addf %13, %17 : vector<16x16xf32>
    %19 = arith.maximumf %14, %17 : vector<16x16xf32>
    %c3_i32 = arith.constant 3 : i32
    %c0_13 = arith.constant 0 : index
    %20 = arith.index_cast %c3_i32 : i32 to index
    %c0_14 = arith.constant 0 : index
    %c0_15 = arith.constant 0 : index
    %21 = vector.load %arg3[%c0_13, %20, %c0_14, %c0_15] : memref<1x4x16x16xf32, #tpu.memory_space<vmem>>, vector<1x1x16x16xf32>
    %22 = vector.shape_cast %21 : vector<1x1x16x16xf32> to vector<16x16xf32>
    %23 = arith.addf %18, %22 : vector<16x16xf32>
    %24 = arith.maximumf %19, %22 : vector<16x16xf32>
    %c4_i32 = arith.constant 4 : i32
    %c0_16 = arith.constant 0 : index
    %c0_17 = arith.constant 0 : index
    %25 = vector.load %arg5[%c0_16, %c0_17] : memref<32x16xf32, #tpu.memory_space<vmem>>, vector<16x16xf32>
    tpu.vector_store %arg5[%c0_16, %c0_17], %23 {strides = array<i32>} : memref<32x16xf32, #tpu.memory_space<vmem>>, vector<16x16xf32>,
    %c16_18 = arith.constant 16 : index
    %c0_19 = arith.constant 0 : index
    %26 = vector.load %arg5[%c16_18, %c0_19] : memref<32x16xf32, #tpu.memory_space<vmem>>, vector<16x16xf32>
    tpu.vector_store %arg5[%c16_18, %c0_19], %24 {strides = array<i32>} : memref<32x16xf32, #tpu.memory_space<vmem>>, vector<16x16xf32>,
    %c0_i32_20 = arith.constant 0 : i32
    %27 = arith.cmpi eq, %arg1, %c0_i32_20 : i32
    %28 = arith.extui %27 : i1 to i32
    %c0_i32_21 = arith.constant 0 : i32
    %29 = arith.cmpi ne, %28, %c0_i32_21 : i32
    scf.if %29 {
      %c0_22 = arith.constant 0 : index
      %c0_23 = arith.constant 0 : index
      %30 = vector.load %arg2[%c0_22, %c0_23] : memref<16x32xf32, #tpu.memory_space<vmem>>, vector<16x32xf32>
      %c0_24 = arith.constant 0 : index
      %c0_25 = arith.constant 0 : index
      %31 = vector.load %arg5[%c0_24, %c0_25] : memref<32x16xf32, #tpu.memory_space<vmem>>, vector<32x16xf32>
      %cst = arith.constant dense<0.000000e+00> : vector<16x16xf32>
      %32 = tpu.matmul %30, %31, %cst {dimension_numbers = #tpu.dot_dimension_numbers<[1], [0], [0], [1], [0, 0, 1, 1], [], []>, precision = #tpu.contract_precision<fp32>} : vector<16x32xf32>, vector<32x16xf32>, vector<16x16xf32> -> vector<16x16xf32>
      %33 = arith.negf %32 : vector<16x16xf32>
      %34 = math.exp %33 : vector<16x16xf32>
      %cst_26 = arith.constant 1.000000e+00 : f32
      %35 = vector.broadcast %cst_26 : f32 to vector<16x16xf32>
      %36 = arith.addf %35, %34 : vector<16x16xf32>
      %37 = arith.divf %35, %36 : vector<16x16xf32>
      %c0_27 = arith.constant 0 : index
      %c0_28 = arith.constant 0 : index
      %c0_29 = arith.constant 0 : index
      %c0_30 = arith.constant 0 : index
      %38 = vector.load %arg4[%c0_27, %c0_28, %c0_29, %c0_30] : memref<1x1x16x16xf32, #tpu.memory_space<vmem>>, vector<1x1x16x16xf32>
      %39 = vector.shape_cast %38 : vector<1x1x16x16xf32> to vector<16x16xf32>
      %40 = vector.shape_cast %37 : vector<16x16xf32> to vector<1x1x16x16xf32>
      tpu.vector_store %arg4[%c0_27, %c0_28, %c0_29, %c0_30], %40 {strides = array<i32>} : memref<1x1x16x16xf32, #tpu.memory_space<vmem>>, vector<1x1x16x16xf32>,
    } else {
    }
    return
  }
  func.func @transform_0(%arg0: i32, %arg1: i32) -> (i32, i32) {
    %c0_i32 = arith.constant 0 : i32
    %c0_i32_0 = arith.constant 0 : i32
    %c0_i32_1 = arith.constant 0 : i32
    return %c0_i32, %c0_i32_0 : i32, i32
  }
  func.func @transform_1(%arg0: i32, %arg1: i32) -> (i32, i32, i32, i32) {
    %c0_i32 = arith.constant 0 : i32
    %c0_i32_0 = arith.constant 0 : i32
    %c0_i32_1 = arith.constant 0 : i32
    return %arg0, %arg1, %c0_i32, %c0_i32_0 : i32, i32, i32, i32
  }
  func.func @transform_2(%arg0: i32, %arg1: i32) -> (i32, i32, i32, i32) {
    %c0_i32 = arith.constant 0 : i32
    %c0_i32_0 = arith.constant 0 : i32
    %c0_i32_1 = arith.constant 0 : i32
    %c0_i32_2 = arith.constant 0 : i32
    return %arg0, %c0_i32, %c0_i32_0, %c0_i32_1 : i32, i32, i32, i32
  }
}

</mosaic_0001>

<bundles_post_ra>
// kernel: tpu_custom_call.1
= control target key start
LH: loop header
LB: loop body
LE: loop exit
PB: predicated region body
PF: predicated region fallthrough
CT: control target
= control target key end

     0   :  { %7 = vsyncpa [#allocation4], 0  ;;  %s1624_s0 = inlined_call_operand.hbm [shape: f32[16,32], index: 0, kind: input, shape index: {}]   ;;  %s1625_s1 = inlined_call_operand.hbm [shape: f32[2,4,16,16], index: 1, kind: input, shape index: {}]   ;;  %s1626_s2 = inlined_call_operand.hbm [shape: f32[2,1,16,16], index: 2, kind: output, shape index: {}]  }
   0x1   :  { %8 = vsyncpa [#allocation7], 0 }
   0x2   :  { %10 = vsyncpa [#allocation7 + $0x1], 0 }
   0x3   :  { %11 = vsyncpa [#allocation5], 0 }
   0x4   :  { %13 = vsyncpa [#allocation5 + $0x1], 0  ;;  %s1354_s9 = smov 0   ;;  %s1356_s10 = smov 0  }
   0x5   :  { %s1358_s11 = smov 0   ;;  %s1360_s12 = smov 0  }
   0x6   :  { %s1362_s13 = smov 0   ;;  %s1364_s14 = smov 0  }
   0x7 LB: > { %s910_s15 = sadd.s32 4294967295, %s1328_s14   ;;  %s911_s16 = sadd.s32 4294967294, %s1328_s14   ;;  %s1328_s14 = sphi %s1364_s14, %s19_s14   ;;  %s1324_s13 = sphi %s1362_s13, %s1650_s13   ;;  %s1320_s12 = sphi %s1360_s12, %s1649_s12   ;;  %s1316_s11 = sphi %s1358_s11, %s1648_s11   ;;  %s1312_s10 = sphi %s1356_s10, %s1647_s10   ;;  %s1308_s9 = sphi %s1354_s9, %s1646_s9  }
   0x8   : > { %p74_p0 = scmp.ne.s32.totalorder %s1312_s10, %s1308_s9  ;;  %p1388_p1 = scmp.eq.s32.totalorder %s910_s15, 0 }
   0x9   : > { %p1392_p2 = scmp.eq.s32.totalorder %s910_s15, 1  ;;  %p104_p3 = scmp.eq.s32.totalorder %s911_s16, 1 }
   0xa   : > { %s1631_s17 = scalar_select %p1388_p1, 1, 0 }
   0xb   : > { %s1632_s18 = scalar_select %p1392_p2, 1, 0 }
   0xc   : > { %p1398_p4 = por %p1388_p1, %p74_p0  ;;  %p912_p5 = scmp.ge.s32.totalorder %s1328_s14, 1 }
   0xd   : > { %p1403_p6 = por %p104_p3, %p74_p0  ;;  %p111_p7 = scmp.lt.s32.totalorder %s1328_s14, 3 }
   0xe   : > { %s1633_s19 = scalar_select %p1398_p4, 1, 0 }
   0xf   : > { %s1634_s20 = scalar_select %p1403_p6, 1, 0 }
  0x10   : > { %p1408_p8 = pnand %p912_p5, %p111_p7  ;;  %s1330_s22 = smov [#allocation3]  }
  0x11   : > { %s123_s23 = sshll.u32 %s1330_s22, 4  ;;  %s31_s25 = sadd.s32 1, %s1324_s13  ;;  %s124_s23 = int_to_ptr.vmem [resolvable:$true] %s123_s23 }
  0x12   : > { %s1635_s21 = scalar_select %p1408_p8, 1, 0 }
  0x13   : > { %p1105_p9 = pneg %p1408_p8  ;;  %s1184_s28 = scalar_lea.hbm %s1624_s0, 256 }
  0x14   : > { %p1185_p12 = scmp.ne.s32.totalorder %s1624_s0, %s1184_s28  ;;  %p1191_p5 = scmp.lt.u32.totalorder %s1184_s28, %s1624_s0 }
  0x15   : > { %p1417_p11 = pnand %p1105_p9, %p1388_p1 }
  0x17   : > { %p1186_p13 = pneg %p1417_p11 }
  0x19   : > { %p1187_p0 = pnand %p1186_p13, %p1185_p12 }
  0x1b   : > { %p1188_p3 = pneg %p1187_p0 }
  0x1d   : > { %p1193_p7 = pnand %p1191_p5, %p1188_p3 }
  0x1f   : > { %1196 = shalt.err (!%p1193_p7)
}
  0x20   : > { %s1197_s5 = scalar_lea.vmem %s124_s23, 256  ;;  %p1205_p4 = scmp.lt.s32.totalorder %s124_s23, %s124_s23 }
  0x21   : > { %p1198_p9 = scmp.ne.s32.totalorder %s124_s23, %s1197_s5  ;;  %p1206_p1 = scmp.lt.s32.totalorder %s1197_s5, %s1197_s5 }
  0x23   : > { %p1200_p10 = pnand %p1198_p9, %p1186_p13  ;;  %p1207_p8 = por %p1206_p1, %p1205_p4 }
  0x25   : > { %p1201_p6 = pneg %p1200_p10 }
  0x27   : > { %p1208_p2 = pnand %p1207_p8, %p1201_p6 }
  0x29   : > { %1211 = shalt.err (!%p1208_p2)
}
  0x2a   : > { %s1331_s6 = smov 128   ;;  %s1332_s7 = smov 8  }
  0x2b   : > { %1108 = dma.hbm_to_vmem [thread:$0]  (!%p1417_p11), %s1624_s0, 256, %s124_s23, [#allocation4], %s1331_s6, %s1331_s6, %s1332_s7  }
  0x2c   : > { %p33_p1 = scmp.ge.s32.totalorder %s31_s25, 2  ;;  %s61_s16 = sadd.s32 1, %s1316_s11 }
  0x2d   : > { %p68_p2 = scmp.ne.s32.totalorder %s1316_s11, %s1312_s10  ;;  %p69_p4 = scmp.eq.s32.totalorder %s1328_s14, 0 }
  0x2e   : > { %s1652_s25 = smov (%p33_p1, %s31_s25), 0  ;;  %p1638_p8 = scmp.ne.s32.totalorder %s1632_s18, 0 }
  0x2f   : > { %p1447_p6 = por %p69_p4, %p68_p2  ;;  %s56_s26 = ssub.s32 %s1324_s13, %s1652_s25 }
  0x30   : > { %p1453_p10 = por %p1638_p8, %p68_p2  ;;  %p1118_p12 = scmp.lt.s32.totalorder %s1328_s14, 2 }
  0x31   : > { %p59_p11 = scmp.eq.s32.totalorder %s56_s26, 0  ;;  %s137_s23 = sand.u32 1, %s1316_s11  }
  0x32   : > { %s915_s27 = sshll.u32 %s137_s23, 6  ;;  %s935_s29 = sshll.u32 %s1324_s13, 10 }
  0x33   : > { %s1462_s28 = scalar_select %p59_p11, %s1316_s11, %s61_s16  }
  0x34   : > { %s1468_s4 = scalar_lea.hbm %s1625_s1, %s935_s29  ;;  %s141_s18 = scalar_lea.vmem [#allocation6], %s915_s27 }
  0x35   : > { %s151_s5 = sshll.u32 %s141_s18, 4  ;;  %p1474_p13 = pnand %p1118_p12, %p1447_p6  ;;  %s1470_s5 = int_to_ptr.vmem [resolvable:$true] %s151_s5 }
  0x36   : > { %s1478_s15 = scalar_lea.sflag [#allocation7], %s137_s23  ;;  %s1212_s16 = scalar_lea.hbm %s1468_s4, 1024 }
  0x37   : > { %p1213_p0 = scmp.ne.s32.totalorder %s1468_s4, %s1212_s16  ;;  %p1214_p3 = pneg %p1474_p13 }
  0x38   : > { %s1217_s22 = scalar_lea.hbm %s1625_s1, 2048  ;;  %p1218_p9 = scmp.lt.u32.totalorder %s1468_s4, %s1625_s1 }
  0x39   : > { %p1215_p5 = pnand %p1214_p3, %p1213_p0  ;;  %p1219_p1 = scmp.lt.u32.totalorder %s1217_s22, %s1212_s16 }
  0x3a   : > { %p1221_p4 = scmp.lt.u32.totalorder %s1212_s16, %s1468_s4 }
  0x3b   : > { %p1216_p7 = pneg %p1215_p5  ;;  %p1220_p2 = por %p1219_p1, %p1218_p9 }
  0x3d   : > { %p1222_p6 = por %p1221_p4, %p1220_p2 }
  0x3f   : > { %p1223_p8 = pnand %p1222_p6, %p1216_p7 }
  0x41   : > { %1226 = shalt.err (!%p1223_p8)
}
  0x42   : > { %s1227_s23 = scalar_lea.vmem %s1470_s5, 1024  ;;  %s1333_s3 = smov [#allocation6]  }
  0x43   : > { %p1228_p12 = scmp.ne.s32.totalorder %s1470_s5, %s1227_s23  ;;  %s1232_s18 = sshll.u32 %s1333_s3, 4  ;;  %s1233_s18 = int_to_ptr.vmem [resolvable:$false] %s1232_s18 }
  0x44   : > { %s1234_s26 = scalar_lea.vmem %s1233_s18, 2048  ;;  %p1235_p5 = scmp.lt.s32.totalorder %s1470_s5, %s1233_s18 }
  0x45   : > { %p1230_p11 = pnand %p1228_p12, %p1214_p3  ;;  %p1236_p9 = scmp.lt.s32.totalorder %s1234_s26, %s1227_s23 }
  0x47   : > { %p1231_p0 = pneg %p1230_p11  ;;  %p1237_p1 = por %p1236_p9, %p1235_p5 }
  0x49   : > { %p1238_p2 = pnand %p1237_p1, %p1231_p0 }
  0x4b   : > { %1241 = shalt.err (!%p1238_p2)
}
  0x4c   : > { %1112 = dma.hbm_to_vmem [thread:$0]  (!%p1474_p13), %s1468_s4, 1024, %s1470_s5, %s1478_s15, %s1331_s6, %s1331_s6, %s1332_s7  }
  0x4d   : > { %p1641_p3 = scmp.ne.s32.totalorder %s1635_s21, 0 }
  0x4e   : > { %p1642_p7 = scmp.ne.s32.totalorder (!%p1641_p3), %s1631_s17, 0 }
  0x4f   : > { %163 = sbr.rel (%p1641_p3) target bundleno = 401 (0x191), region = 28 }
  0x56   : > { %1295 = dma.done.wait (%p1642_p7), [#allocation4], 256  }
  0x57   : > { %1297 = vsyncadd (%p1642_p7), [#allocation4], 4294967040  ;;  %s1516_s16 = sand.u32 1, %s1312_s10   ;;  %p1643_p13 = scmp.ne.s32.totalorder %s1633_s19, 0 }
  0x58   : > { %s920_s8 = sshll.u32 %s1516_s16, 6  ;;  %s170_s27 = scalar_lea.sflag [#allocation7], %s1516_s16 }
  0x59   : > { %s1520_s22 = scalar_lea.vmem [#allocation6], %s920_s8 }
  0x5a   : > { %1299 = dma.done.wait (%p1643_p13), %s170_s27, 1024  }
  0x5b   : > { %1301 = vsyncadd (%p1643_p13), %s170_s27, 4294966272  ;;  %vm199_vm0 = vcmask 130048   ;;  %v1334_v0 = vmov 0.0   ;;  %v1335_v1 = vmov -3.4028235e+38   ;;  %v210_v2 = vld [vmem:[%s1520_s22] sm:$0xff] }
  0x5c   : > { %200 = vst.msk [vmem:[#allocation2] sm:$0xff] %vm199_vm0, %v1334_v0  ;;  %201 = vst.msk [vmem:[#allocation2 + $0x8] sm:$0xff] %vm199_vm0, %v1334_v0  ;;  %v211_v3 = vld [vmem:[%s1520_s22 + $0x8] sm:$0xff]  ;;  %v922_v4 = vld [vmem:[%s1520_s22 + $0x10] sm:$0xff]  ;;  %vm251_vm1 = vcmask 261120   ;;  %s921_s17 = sshll.u32 %s1516_s16, 4 }
  0x5d   : > { %202 = vst.msk [vmem:[#allocation2 + $0x10] sm:$0xff] %vm199_vm0, %v1334_v0  ;;  %203 = vst.msk [vmem:[#allocation2 + $0x18] sm:$0xff] %vm199_vm0, %v1334_v0  ;;  %v923_v7 = vld [vmem:[%s1520_s22 + $0x18] sm:$0xff]  ;;  %v924_v10 = vld [vmem:[%s1520_s22 + $0x20] sm:$0xff]  ;;  %s936_s19 = sshll.u32 %s1320_s12, 8  ;;  %s193_s21 = scalar_lea.vmem [#allocation8], %s921_s17 }
  0x5e   : > { %204 = vst.msk [vmem:[#allocation2 + $0x10] sm:$0xff] %vm199_vm0, %v1335_v1  ;;  %205 = vst.msk [vmem:[#allocation2 + $0x18] sm:$0xff] %vm199_vm0, %v1335_v1  ;;  %v925_v11 = vld [vmem:[%s1520_s22 + $0x28] sm:$0xff]  ;;  %v245_v18 = vld [vmem:[#allocation3] sm:$0xff]  ;;  %s814_s6 = sshll.u32 %s193_s21, 4  ;;  %s1571_s5 = scalar_lea.hbm %s1626_s2, %s936_s19  ;;  %s1573_s6 = int_to_ptr.vmem [resolvable:$true] %s814_s6 }
  0x5f   : > { %v246_v19 = vld [vmem:[#allocation3 + $0x8] sm:$0xff]  ;;  %v926_v20 = vld [vmem:[%s1520_s22 + $0x30] sm:$0xff]  ;;  %v253_v22 = vsel %vm251_vm1, %v245_v18, 0  ;;  %s801_s15 = scalar_lea.sflag [#allocation5], %s1516_s16  ;;  %s1242_s12 = scalar_lea.vmem %s1573_s6, 256 }
  0x60   : > { %v927_v21 = vld [vmem:[%s1520_s22 + $0x38] sm:$0xff]  ;;  %v256_v23 = vsel %vm251_vm1, %v246_v19, 0  ;;  %v1540_v28 = vand.u32 4294901760, %v253_v22  ;;  %p1243_p4 = scmp.ne.s32.totalorder %s1573_s6, %s1242_s12  ;;  %s1336_s29 = smov [#allocation8]  }
  0x61   : > { %v1545_v34 = vand.u32 4294901760, %v256_v23  ;;  %s1246_s30 = sshll.u32 %s1336_s29, 4  ;;  %s1247_s30 = int_to_ptr.vmem [resolvable:$false] %s1246_s30 }
  0x62   : > { %v1543_v33 = vsub.f32 %v253_v22, %v1540_v28  ;;  %p1244_p6 = pnand %p1243_p4, %p1453_p10  ;;  %s1248_s23 = scalar_lea.vmem %s1247_s30, 512 }
  0x63   : > { %v206_v5 = vld [vmem:[#allocation2] sm:$0xff]  ;;  %v207_v6 = vld [vmem:[#allocation2 + $0x8] sm:$0xff]  ;;  %v1554_v39 = vsub.f32 %v256_v23, %v1545_v34  ;;  %p1249_p12 = scmp.lt.s32.totalorder %s1573_s6, %s1247_s30  ;;  %p1250_p11 = scmp.lt.s32.totalorder %s1248_s23, %s1242_s12 }
  0x64   : > { %v212_v8 = vadd.f32 %v210_v2, %v206_v5  ;;  %v213_v9 = vadd.f32 %v211_v3, %v207_v6  ;;  %v329_v37 = vand.u32 4294901760, %v1543_v33  ;;  %p1245_p8 = pneg %p1244_p6 }
  0x65   : > { %v208_v12 = vld [vmem:[#allocation2 + $0x10] sm:$0xff]  ;;  %v209_v13 = vld [vmem:[#allocation2 + $0x18] sm:$0xff]  ;;  %v339_v43 = vand.u32 4294901760, %v1554_v39  ;;  %p1251_p0 = por %p1250_p11, %p1249_p12 }
  0x66   : > { %v219_v14 = vadd.f32 %v922_v4, %v212_v8  ;;  %v220_v15 = vadd.f32 %v923_v7, %v213_v9  ;;  %v214_v16 = vmax.f32 %v208_v12, %v210_v2  ;;  %v215_v17 = vmax.f32 %v209_v13, %v211_v3  ;;  %1014 = vmatprep.mubr.f32.mxu0 %v329_v37 }
  0x67   : > { %v330_v38 = vsub.f32 %v1543_v33, %v329_v37  ;;  %v340_v52 = vsub.f32 %v1554_v39, %v339_v43  ;;  %p1252_p5 = pnand %p1251_p0, %p1245_p8 }
  0x68   : > { %v226_v24 = vadd.f32 %v924_v10, %v219_v14  ;;  %v227_v25 = vadd.f32 %v925_v11, %v220_v15  ;;  %v221_v26 = vmax.f32 %v214_v16, %v922_v4  ;;  %v222_v27 = vmax.f32 %v215_v17, %v923_v7 }
  0x69   : > { %v331_v40 = vand.u32 4294901760, %v330_v38  ;;  %v341_v0 = vand.u32 4294901760, %v340_v52 }
  0x6a   : > { %v233_v29 = vadd.f32 %v926_v20, %v226_v24  ;;  %v234_v30 = vadd.f32 %v927_v21, %v227_v25  ;;  %v228_v31 = vmax.f32 %v221_v26, %v924_v10  ;;  %v229_v32 = vmax.f32 %v222_v27, %v925_v11 }
  0x6b   : > { %981 = vmatprep.mubr.f32.mxu1 %v331_v40 }
  0x6c   : > { %238 = vst.msk [vmem:[#allocation2] sm:$0xff] %vm199_vm0, %v233_v29  ;;  %239 = vst.msk [vmem:[#allocation2 + $0x8] sm:$0xff] %vm199_vm0, %v234_v30  ;;  %v235_v35 = vmax.f32 %v228_v31, %v926_v20  ;;  %v236_v36 = vmax.f32 %v229_v32, %v927_v21 }
  0x6e   : > { %240 = vst.msk [vmem:[#allocation2 + $0x10] sm:$0xff] %vm199_vm0, %v235_v35  ;;  %241 = vst.msk [vmem:[#allocation2 + $0x18] sm:$0xff] %vm199_vm0, %v236_v36 }
  0x73   : > { %v247_v41 = vld [vmem:[#allocation2] sm:$0xff]  ;;  %v248_v42 = vld [vmem:[#allocation2 + $0x8] sm:$0xff] }
  0x74   : > { %v259_v44 = vand.u32 4294901760, %v247_v41  ;;  %v262_v45 = vand.u32 4294901760, %v248_v42 }
  0x75   : > { %v249_v46 = vld [vmem:[#allocation2 + $0x10] sm:$0xff]  ;;  %v250_v47 = vld [vmem:[#allocation2 + $0x18] sm:$0xff] }
  0x76   : > { %v1039_v48 = vpack.c.bf16 %v262_v45, %v259_v44  ;;  %v265_v49 = vand.u32 4294901760, %v249_v46  ;;  %v268_v50 = vand.u32 4294901760, %v250_v47  ;;  %v349_v51 = vsub.f32 %v247_v41, %v259_v44 }
  0x77   : > { %v356_v53 = vsub.f32 %v248_v42, %v262_v45 }
  0x78   : > { %1040 = vmatprep.subr.bf16.mxu1 %v1039_v48  ;;  %1064 = vmatprep.subr.bf16.mxu0 %v1039_v48  ;;  %v1043_v54 = vpack.c.bf16 %v268_v50, %v265_v49  ;;  %v350_v55 = vand.u32 4294901760, %v349_v51  ;;  %v363_v56 = vsub.f32 %v249_v46, %v265_v49  ;;  %v370_v57 = vsub.f32 %v250_v47, %v268_v50 }
  0x79   : > { %1042 = vmatpush3.bf16.msra.mxu1 %v1039_v48  ;;  %1066 = vmatpush3.bf16.msra.mxu0 %v1039_v48  ;;  %v357_v58 = vand.u32 4294901760, %v356_v53  ;;  %v1055_v10 = vpack.c.bf16 %v356_v53, %v349_v51 }
  0x7a   : > { %1044 = vmatprep.subr.bf16.mxu1 %v1043_v54  ;;  %1068 = vmatprep.subr.bf16.mxu0 %v1043_v54  ;;  %v351_v59 = vsub.f32 %v349_v51, %v350_v55  ;;  %v364_v60 = vand.u32 4294901760, %v363_v56  ;;  %v371_v61 = vand.u32 4294901760, %v370_v57  ;;  %v1059_v11 = vpack.c.bf16 %v370_v57, %v363_v56 }
  0x7b   : > { %v358_v62 = vsub.f32 %v356_v53, %v357_v58  ;;  %v1071_v63 = vpack.c.bf16 %v357_v58, %v350_v55 }
  0x7c   : > { %v352_v1 = vand.u32 4294901760, %v351_v59  ;;  %v365_v2 = vsub.f32 %v363_v56, %v364_v60  ;;  %v372_v3 = vsub.f32 %v370_v57, %v371_v61  ;;  %v1075_v7 = vpack.c.bf16 %v371_v61, %v364_v60 }
  0x7d   : > { %1046 = vmatpush3.bf16.msra.mxu1 %v1043_v54  ;;  %1070 = vmatpush3.bf16.msra.mxu0 %v1043_v54  ;;  %v359_v4 = vand.u32 4294901760, %v358_v62 }
  0x7e   : > { %1072 = vmatprep.subr.bf16.mxu0 %v1071_v63  ;;  %v366_v5 = vand.u32 4294901760, %v365_v2  ;;  %v373_v6 = vand.u32 4294901760, %v372_v3 }
  0x7f   : > { %v1047_v8 = vpack.c.bf16 %v359_v4, %v352_v1 }
  0x80   : > { %982 = vmatmul.mubr.f32.vlgmr.msra.gmra.mrb[0].mxu1 %v341_v0  ;;  %1015 = vmatmul.mubr.f32.vlgmr.msra.gmra.mrb[0].mxu0 %v339_v43  ;;  %v1051_v9 = vpack.c.bf16 %v373_v6, %v366_v5 }
  0x81   : > { %1048 = vmatprep.subr.bf16.mxu1 %v1047_v8  ;;  %1074 = vmatpush3.bf16.msra.mxu0 %v1071_v63 }
  0x82   : > { %1050 = vmatpush3.bf16.msra.mxu1 %v1047_v8  ;;  %1076 = vmatprep.subr.bf16.mxu0 %v1075_v7 }
  0x83   : > { %1052 = vmatprep.subr.bf16.mxu1 %v1051_v9  ;;  %992 = vmatprep.mubr.f32.mxu1 %v1540_v28 }
  0x84   : > { %1025 = vmatprep.mubr.f32.mxu0 %v1540_v28 }
  0x85   : > { %1078 = vmatpush3.bf16.msra.mxu0 %v1075_v7 }
  0x86   : > { %1054 = vmatpush3.bf16.msra.mxu1 %v1051_v9  ;;  %1080 = vmatprep.subr.bf16.mxu0 %v1039_v48 }
  0x87   : > { %1056 = vmatprep.subr.bf16.mxu1 %v1055_v10 }
  0x88   : > { %1026 = vmatmul.mubr.f32.vlgmr.msra.gmra.mrb[0].mxu0 %v1545_v34 }
  0x89   : > { %993 = vmatmul.mubr.f32.vlgmr.msra.gmra.mrb[0].mxu1 %v1545_v34  ;;  %1082 = vmatpush3.bf16.msra.mxu0 %v1039_v48 }
  0x8a   : > { %1058 = vmatpush3.bf16.msra.mxu1 %v1055_v10  ;;  %1084 = vmatprep.subr.bf16.mxu0 %v1043_v54 }
  0x8b   : > { %1060 = vmatprep.subr.bf16.mxu1 %v1059_v11  ;;  %1003 = vmatprep.mubr.f32.mxu1 %v1543_v33 }
  0x8c   : > { %1036 = vmatprep.mubr.f32.mxu0 %v1540_v28 }
  0x8d   : > { %1086 = vmatpush3.bf16.msra.mxu0 %v1043_v54 }
  0x8e   : > { %1062 = vmatpush3.bf16.msra.mxu1 %v1059_v11 }
  0x90   : > { %1037 = vmatmul.mubr.f32.vlgmr.msra.gmra.mrb[0].mxu0 %v1545_v34 }
  0x91   : > { %1004 = vmatmul.mubr.f32.vlgmr.msra.gmra.mrb[0].mxu1 %v1554_v39 }
 0x163   : > { %v1038_v12 = vpop.f32.mrb[0].mxu0 }
 0x164   : > { %v1005_v13 = vpop.f32.mrb[0].mxu1  ;;  %v776_v14 = vpop.f32.mrb[1].mxu0 }
 0x165   : > { %v1087_v15 = vadd.f32 %v1038_v12, %v1005_v13  ;;  %v520_v16 = vpop.f32.mrb[1].mxu1 }
 0x166   : > { %v1088_v17 = vadd.f32 %v776_v14, %v520_v16 }
 0x167   : > { %v929_v18 = vmul.f32 -1.442695, %v1087_v15 }
 0x168   : > { %v928_v19 = vmul.f32 -1.442695, %v1088_v17 }
 0x169   : > { %1176 = vpow2.f32 %v929_v18 }
 0x16a   : > { %1178 = vpow2.f32 %v928_v19 }
 0x173   : > { %v1177_v20 = vpop.eup %1176 }
 0x174   : > { %v1179_v21 = vpop.eup %1178  ;;  %v793_v22 = vadd.f32 1.0, %v1177_v20 }
 0x175   : > { %v792_v23 = vadd.f32 1.0, %v1179_v21 }
 0x176   : > { %1180 = vrcp.f32 %v793_v22 }
 0x177   : > { %1182 = vrcp.f32 %v792_v23 }
 0x180   : > { %v1181_v24 = vpop.eup %1180 }
 0x181   : > { %v1183_v25 = vpop.eup %1182  ;;  %799 = vst.msk [vmem:[%s193_s21 + $0x8] sm:$0xff] %vm199_vm0, %v1181_v24 }
 0x182   : > { %798 = vst.msk [vmem:[%s193_s21] sm:$0xff] %vm199_vm0, %v1183_v25 }
 0x183   : > { %1255 = shalt.err (!%p1252_p5)
}
 0x184   : > { %s1256_s3 = scalar_lea.hbm %s1571_s5, 256  ;;  %s1260_s8 = scalar_lea.hbm %s1626_s2, 512 }
 0x185   : > { %p1257_p9 = scmp.ne.s32.totalorder %s1571_s5, %s1256_s3  ;;  %p1261_p3 = scmp.lt.u32.totalorder %s1571_s5, %s1626_s2 }
 0x186   : > { %p1262_p7 = scmp.lt.u32.totalorder %s1260_s8, %s1256_s3  ;;  %p1264_p4 = scmp.lt.u32.totalorder %s1256_s3, %s1571_s5 }
 0x187   : > { %p1258_p1 = pnand %p1257_p9, %p1453_p10 }
 0x188   : > { %p1263_p13 = por %p1262_p7, %p1261_p3 }
 0x189   : > { %p1259_p2 = pneg %p1258_p1 }
 0x18a   : > { %p1265_p6 = por %p1264_p4, %p1263_p13 }
 0x18c   : > { %p1266_p8 = pnand %p1265_p6, %p1259_p2 }
 0x18e   : > { %1269 = shalt.err (!%p1266_p8)
}
 0x18f   : > { %s1337_s17 = smov 128   ;;  %s1338_s19 = smov 8  }
 0x190   : > { %1103 = dma.vmem_to_hbm [thread:$0]  (%p1453_p10), %s1573_s6, 256, %s1571_s5, %s801_s15, %s1337_s17, %s1337_s17, %s1338_s19  }
 0x191 PF: > { %s829_s21 = sand.u32 1, %s1308_s9   ;;  %p1644_p12 = scmp.ne.s32.totalorder %s1634_s20, 0 }
 0x192   : > { %p1645_p11 = scmp.ge.s32.totalorder %s1328_s14, 2  ;;  %s830_s7 = scalar_lea.sflag [#allocation5], %s829_s21 }
 0x194   : > { %p1114_p0 = pnand %p1645_p11, %p1644_p12 }
 0x196   : > { %1303 = dma.done.wait (!%p1114_p0), %s830_s7, 256  }
 0x197   : > { %1305 = vsyncadd (!%p1114_p0), %s830_s7, 4294967040  ;;  %s19_s14 = sadd.s32 1, %s1328_s14   ;;  %s1646_s9 = smov %s1312_s10 }
 0x198   : > { %p16_p5 = scmp.ge.s32.totalorder %s19_s14, 4   ;;  %s1647_s10 = smov %s1316_s11 }
 0x199   : > { %s1648_s11 = smov %s1462_s28  ;;  %s1649_s12 = smov %s1324_s13 }
 0x19a   : > { %s1650_s13 = smov %s1652_s25  ;;  %18 = sbr.rel (!%p16_p5) target bundleno = 7 (0x7), region = 89 }
 0x1a1   :  { %835 = vsyncpa [#allocation4], 1 }
 0x1a2   :  { %837 = vsyncpa [#allocation4 + $0x1], 1 }
 0x1a3   :  { %838 = vsyncpa [#allocation7], 1 }
 0x1a4   :  { %840 = vsyncpa [#allocation7 + $0x1], 1 }
 0x1a5   :  { %841 = vsyncpa [#allocation5], 1 }
 0x1a6   :  { %843 = vsyncpa [#allocation5 + $0x1], 1 }

</bundles_post_ra>
